<compile_context>
chip_gen: v6e
topology: v6e:2x2x1
jax: 0.10.0
libtpu: 0.0.40
codegen_flags: <defaults>
</compile_context>

<pallas_src>
import jax
import jax.numpy as jnp
from jax.experimental import pallas as pl
from jax.experimental.pallas import tpu as pltpu


def decoder_kernel(zp_ref, w1_ref, b1_ref, w2_ref, b2_ref, out_ref):
    """One packed batch tile: out = relu(zp @ W1p + b1p) @ W2p + b2p."""
    z = zp_ref[...]
    if z.dtype != w1_ref.dtype:          # static (trace-time) branch
        z = z.astype(w1_ref.dtype)
    h = jnp.dot(z, w1_ref[...], preferred_element_type=jnp.float32) + b1_ref[...]
    h = jnp.maximum(h, 0.0)              # ReLU (VPU)
    out = jnp.dot(h, w2_ref[...], preferred_element_type=jnp.float32) + b2_ref[...]
    out_ref[...] = out.astype(out_ref.dtype)


def _block_diag_replicate(w, r):
    """(k, n) -> (r*k, r*n) block-diagonal with r copies of w on the diagonal."""
    k, n = w.shape
    eye = jnp.eye(r, dtype=w.dtype)
    return (eye[:, None, :, None] * w[None, :, None, :]).reshape(r * k, r * n)


def decoder_forward(z, params, *, pack=32, block_rows=8192, min_rows_for_pallas=2048):
    """Pallas wrapper for Decoder.forward. Accepts z of shape (..., latent_dim).

    pack:     rows packed per lane-row (R). 16-24 on v5e, 32-64 on v6e,
              16-32 on v7x; default 32 -> 128-lane-dense input.
    block_rows: original batch rows per grid step (packed tile = block_rows/pack
              sublanes).
    """
    w1_t, b1 = params["w1_t"], params["b1"]
    w2_t, b2 = params["w2_t"], params["b2"]
    latent_dim, nhidden = w1_t.shape
    obs_dim = w2_t.shape[1]
    assert z.shape[-1] == latent_dim

    lead_shape = z.shape[:-1]
    z2 = z.reshape(-1, latent_dim)
    n_rows = z2.shape[0]
    out_dtype = jnp.promote_types(z.dtype, w1_t.dtype)

    # Small-batch bypass: let XLA fuse it with surrounding ops.
    if n_rows < min_rows_for_pallas:
        h = jnp.maximum(z2.astype(out_dtype) @ w1_t + b1, 0.0)
        out = h @ w2_t + b2
        return out.reshape(*lead_shape, obs_dim).astype(out_dtype)

    r = pack
    # Pad only up to a multiple of R (< R rows); the common large-batch case
    # (n_rows % R == 0) pays no pad and no output slice.
    pad_rows = (-n_rows) % r
    if pad_rows:
        z2 = jnp.pad(z2, ((0, pad_rows), (0, 0)))
    m_packed = (n_rows + pad_rows) // r

    # Lane-packed views (contiguous row-major reshapes: free) + replicated weights.
    zp = z2.reshape(m_packed, r * latent_dim)
    w1p = _block_diag_replicate(w1_t, r)                   # (r*latent, r*nhidden)
    w2p = _block_diag_replicate(w2_t, r)                   # (r*nhidden, r*obs)
    b1p = jnp.tile(b1.reshape(1, nhidden), (1, r))         # (1, r*nhidden)
    b2p = jnp.tile(b2.reshape(1, obs_dim), (1, r))         # (1, r*obs)

    # Packed-row tile size.
    bm = max(block_rows // r, 8)
    if m_packed <= bm:
        bm = m_packed                 # single tile: "block == full dim" exception
    else:
        bm = max((bm // 8) * 8, 8)    # keep sublane-aligned tiles
    grid = (pl.cdiv(m_packed, bm),)   # ragged last tile: OOB writes dropped by Pallas

    # Advisory cost hints based on the useful (unpadded) work.
    flops = 2 * n_rows * (latent_dim * nhidden + nhidden * obs_dim)
    bytes_accessed = int(z2.dtype.itemsize) * n_rows * latent_dim + 4 * (
        n_rows * obs_dim
        + (r * latent_dim) * (r * nhidden)
        + (r * nhidden) * (r * obs_dim)
        + r * (nhidden + obs_dim)
    )

    out_p = pl.pallas_call(
        decoder_kernel,
        out_shape=jax.ShapeDtypeStruct((m_packed, r * obs_dim), out_dtype),
        grid=grid,
        in_specs=[
            # Packed batch tile of z (lane-dense DMA).
            pl.BlockSpec((bm, r * latent_dim), lambda i: (i, 0)),
            # Constant index maps: weights & biases loaded once, stay in VMEM.
            pl.BlockSpec((r * latent_dim, r * nhidden), lambda i: (0, 0)),
            pl.BlockSpec((1, r * nhidden), lambda i: (0, 0)),
            pl.BlockSpec((r * nhidden, r * obs_dim), lambda i: (0, 0)),
            pl.BlockSpec((1, r * obs_dim), lambda i: (0, 0)),
        ],
        out_specs=pl.BlockSpec((bm, r * obs_dim), lambda i: (i, 0)),
        compiler_params=pltpu.CompilerParams(
            dimension_semantics=("parallel",),
        ),
        cost_estimate=pl.CostEstimate(
            flops=flops, transcendentals=0, bytes_accessed=bytes_accessed
        ),
    )(zp, w1p, b1p, w2p, b2p)

    out = out_p.reshape(n_rows + pad_rows, obs_dim)   # free contiguous reshape
    if pad_rows:
        out = out[:n_rows]
    return out.reshape(*lead_shape, obs_dim)


def make_params(key, latent_dim=4, obs_dim=2, nhidden=20):
    """PyTorch nn.Linear-style init (uniform +-1/sqrt(fan_in)), pre-transposed."""
    k1, k2, k3, k4 = jax.random.split(key, 4)

    def u(k, shape, bound):
        return jax.random.uniform(
            k, shape, dtype=jnp.float32, minval=-bound, maxval=bound
        )

    bound1 = float(latent_dim) ** -0.5
    bound2 = float(nhidden) ** -0.5
    # PyTorch stores Linear weight as (out, in); we store the transpose (in, out).
    w1_t = u(k1, (latent_dim, nhidden), bound1)
    b1 = u(k2, (1, nhidden), bound1)
    w2_t = u(k3, (nhidden, obs_dim), bound2)
    b2 = u(k4, (1, obs_dim), bound2)
    return {"w1_t": w1_t, "b1": b1, "w2_t": w2_t, "b2": b2}


def decoder_ref(z, params):
    """Pure-JAX reference matching PyTorch Decoder.forward."""
    h = jnp.maximum(z @ params["w1_t"] + params["b1"], 0.0)
    return h @ params["w2_t"] + params["b2"]


if __name__ == "__main__":
    latent_dim, obs_dim, nhidden = 4, 2, 20
    key = jax.random.PRNGKey(0)
    k_param, k_z1, k_z2 = jax.random.split(key, 3)
    params = make_params(k_param, latent_dim, obs_dim, nhidden)

    # Case 1: multi-step grid with a ragged last tile (576 rows, R=32 ->
    # 18 packed rows; bm=8 -> grid=(3,), last tile partially out of bounds).
    z1 = jax.random.normal(k_z1, (8, 72, latent_dim), dtype=jnp.float32)
    fwd1 = jax.jit(
        lambda x: decoder_forward(x, params, pack=32, block_rows=256, min_rows_for_pallas=0)
    )
    out1 = jax.block_until_ready(fwd1(z1))
    ref1 = decoder_ref(z1, params)
    assert out1.shape == ref1.shape == (8, 72, obs_dim)
    assert jnp.allclose(out1, ref1, atol=1e-4, rtol=1e-4), "mismatch (ragged grid)"

    # Case 2: batch not a multiple of the packing factor (small pad + tail slice).
    z2 = jax.random.normal(k_z2, (3, 37, latent_dim), dtype=jnp.float32)  # 111 rows
    out2 = jax.block_until_ready(
        decoder_forward(z2, params, pack=32, block_rows=256, min_rows_for_pallas=0)
    )
    ref2 = decoder_ref(z2, params)
    assert out2.shape == ref2.shape == (3, 37, obs_dim)
    assert jnp.allclose(out2, ref2, atol=1e-4, rtol=1e-4), "mismatch (non-multiple-of-R)"

    # Case 3: default small-batch bypass (pure JAX, XLA-fused).
    out3 = jax.block_until_ready(decoder_forward(z2, params))
    assert jnp.allclose(out3, ref2, atol=1e-4, rtol=1e-4), "mismatch (bypass)"

    print("KERNEL_OK")
</pallas_src>

<mosaic_0001>
module attributes {stable_mosaic.version = 11 : i64} {
  func.func @decoder_kernel(%arg0: i32, %arg1: memref<8x128xf32, #tpu.memory_space<vmem>>, %arg2: memref<128x640xf32, #tpu.memory_space<vmem>>, %arg3: memref<1x640xf32, #tpu.memory_space<vmem>>, %arg4: memref<640x64xf32, #tpu.memory_space<vmem>>, %arg5: memref<1x64xf32, #tpu.memory_space<vmem>>, %arg6: memref<8x64xf32, #tpu.memory_space<vmem>>) attributes {dimension_semantics = [#tpu.dimension_semantics<parallel>], iteration_bounds = array<i64: 3>, scalar_prefetch = 0 : i64, scratch_operands = 0 : i64, tpu.core_type = #tpu.core_type<tc>, window_params = [{transform_indices = @transform_0, window_bounds = array<i64: 8, 128>}, {pipeline_mode = #tpu.pipeline_mode<synchronous>, transform_indices = @transform_1, window_bounds = array<i64: 128, 640>}, {pipeline_mode = #tpu.pipeline_mode<synchronous>, transform_indices = @transform_2, window_bounds = array<i64: 1, 640>}, {pipeline_mode = #tpu.pipeline_mode<synchronous>, transform_indices = @transform_3, window_bounds = array<i64: 640, 64>}, {pipeline_mode = #tpu.pipeline_mode<synchronous>, transform_indices = @transform_4, window_bounds = array<i64: 1, 64>}, {transform_indices = @transform_5, window_bounds = array<i64: 8, 64>}]} {
    %c0 = arith.constant 0 : index
    %c0_0 = arith.constant 0 : index
    %0 = vector.load %arg1[%c0, %c0_0] : memref<8x128xf32, #tpu.memory_space<vmem>>, vector<8x128xf32>
    %c0_1 = arith.constant 0 : index
    %c0_2 = arith.constant 0 : index
    %1 = vector.load %arg2[%c0_1, %c0_2] : memref<128x640xf32, #tpu.memory_space<vmem>>, vector<128x640xf32>
    %cst = arith.constant dense<0.000000e+00> : vector<8x640xf32>
    %2 = tpu.matmul %0, %1, %cst {dimension_numbers = #tpu.dot_dimension_numbers<[1], [0], [0], [1], [0, 0, 1, 1], [], []>} : vector<8x128xf32>, vector<128x640xf32>, vector<8x640xf32> -> vector<8x640xf32>
    %c0_3 = arith.constant 0 : index
    %c0_4 = arith.constant 0 : index
    %3 = vector.load %arg3[%c0_3, %c0_4] : memref<1x640xf32, #tpu.memory_space<vmem>>, vector<1x640xf32>
    %4 = vector.broadcast %3 : vector<1x640xf32> to vector<8x640xf32>
    %5 = arith.addf %2, %4 : vector<8x640xf32>
    %cst_5 = arith.constant 0.000000e+00 : f32
    %6 = vector.broadcast %cst_5 : f32 to vector<8x640xf32>
    %7 = arith.maximumf %5, %6 : vector<8x640xf32>
    %c0_6 = arith.constant 0 : index
    %c0_7 = arith.constant 0 : index
    %8 = vector.load %arg4[%c0_6, %c0_7] : memref<640x64xf32, #tpu.memory_space<vmem>>, vector<640x64xf32>
    %cst_8 = arith.constant dense<0.000000e+00> : vector<8x64xf32>
    %9 = tpu.matmul %7, %8, %cst_8 {dimension_numbers = #tpu.dot_dimension_numbers<[1], [0], [0], [1], [0, 0, 1, 1], [], []>} : vector<8x640xf32>, vector<640x64xf32>, vector<8x64xf32> -> vector<8x64xf32>
    %c0_9 = arith.constant 0 : index
    %c0_10 = arith.constant 0 : index
    %10 = vector.load %arg5[%c0_9, %c0_10] : memref<1x64xf32, #tpu.memory_space<vmem>>, vector<1x64xf32>
    %11 = vector.broadcast %10 : vector<1x64xf32> to vector<8x64xf32>
    %12 = arith.addf %9, %11 : vector<8x64xf32>
    %c0_11 = arith.constant 0 : index
    %c0_12 = arith.constant 0 : index
    %13 = vector.load %arg6[%c0_11, %c0_12] : memref<8x64xf32, #tpu.memory_space<vmem>>, vector<8x64xf32>
    tpu.vector_store %arg6[%c0_11, %c0_12], %12 {strides = array<i32>} : memref<8x64xf32, #tpu.memory_space<vmem>>, vector<8x64xf32>,
    return
  }
  func.func @transform_0(%arg0: i32) -> (i32, i32) {
    %c0_i32 = arith.constant 0 : i32
    %c0_i32_0 = arith.constant 0 : i32
    return %arg0, %c0_i32 : i32, i32
  }
  func.func @transform_1(%arg0: i32) -> (i32, i32) {
    %c0_i32 = arith.constant 0 : i32
    %c0_i32_0 = arith.constant 0 : i32
    %c0_i32_1 = arith.constant 0 : i32
    return %c0_i32, %c0_i32_0 : i32, i32
  }
  func.func @transform_2(%arg0: i32) -> (i32, i32) {
    %c0_i32 = arith.constant 0 : i32
    %c0_i32_0 = arith.constant 0 : i32
    %c0_i32_1 = arith.constant 0 : i32
    return %c0_i32, %c0_i32_0 : i32, i32
  }
  func.func @transform_3(%arg0: i32) -> (i32, i32) {
    %c0_i32 = arith.constant 0 : i32
    %c0_i32_0 = arith.constant 0 : i32
    %c0_i32_1 = arith.constant 0 : i32
    return %c0_i32, %c0_i32_0 : i32, i32
  }
  func.func @transform_4(%arg0: i32) -> (i32, i32) {
    %c0_i32 = arith.constant 0 : i32
    %c0_i32_0 = arith.constant 0 : i32
    %c0_i32_1 = arith.constant 0 : i32
    return %c0_i32, %c0_i32_0 : i32, i32
  }
  func.func @transform_5(%arg0: i32) -> (i32, i32) {
    %c0_i32 = arith.constant 0 : i32
    %c0_i32_0 = arith.constant 0 : i32
    return %arg0, %c0_i32 : i32, i32
  }
}

</mosaic_0001>

<bundles_post_ra>
// kernel: _lambda_.1
= control target key start
LH: loop header
LB: loop body
LE: loop exit
PB: predicated region body
PF: predicated region fallthrough
CT: control target
= control target key end

     0   :  { %s1131_s18 = smov 0   ;;  %s1701_s0 = inlined_call_operand.vmem [shape: f32[18,128], index: 0, kind: input, shape index: {}]   ;;  %s1702_s1 = inlined_call_operand.vmem [shape: f32[128,640], index: 1, kind: input, shape index: {}]   ;;  %s1703_s2 = inlined_call_operand.vmem [shape: f32[1,640], index: 2, kind: input, shape index: {}]   ;;  %s1704_s3 = inlined_call_operand.vmem [shape: f32[640,64], index: 3, kind: input, shape index: {}]   ;;  %s1705_s4 = inlined_call_operand.vmem [shape: f32[1,64], index: 4, kind: input, shape index: {}]   ;;  %s1706_s5 = inlined_call_operand.vmem [shape: f32[18,64], index: 5, kind: output, shape index: {}]  }
   0x1 LB: > { %s897_s19 = sadd.s32 4294967295, %s1097_s18   ;;  %p901_p0 = scmp.ge.s32.totalorder %s1097_s18, 1  ;;  %s1097_s18 = sphi %s1131_s18, %s15_s18  }
   0x2   : > { %p186_p1 = scmp.lt.s32.totalorder %s1097_s18, 4 }
   0x4   : > { %p187_p2 = pnand %p901_p0, %p186_p1 }
   0x5   : > { %p1253_p3 = scmp.lt.s32.totalorder (!%p187_p2), %s897_s19, 2 }
   0x6   : > { %190 = sbr.rel (%p187_p2) target bundleno = 472 (0x1d8), region = 40 }
   0xb   : > { %v297_v0 = vld [vmem:[%s1702_s1 + $0x260] sm:$0xff]  ;;  %v296_v1 = vld [vmem:[%s1702_s1 + $0x258] sm:$0xff]  ;;  %v299_v3 = vld [vmem:[%s1702_s1 + $0x270] sm:$0xff]  ;;  %v1099_v6 = vmov 0.0   ;;  %s1709_s19 = smov (!%p1253_p3, %s897_s19), 2  ;;  %vm1100_vm0 = vmmov 0  }
   0xc   : > { %v292_v2 = vld [vmem:[%s1702_s1 + $0x238] sm:$0xff]  ;;  %328 = vmatprep.subr.mxu0 %v297_v0  ;;  %v291_v4 = vld [vmem:[%s1702_s1 + $0x230] sm:$0xff]  ;;  %v298_v5 = vld [vmem:[%s1702_s1 + $0x268] sm:$0xff]  ;;  %392 = vmatprep.mubr.f32.mxu0 %v1099_v6  ;;  %s902_s10 = sshll.u32 %s1709_s19, 3  ;;  %vm842_vm1 = vcmask 523264  }
   0xd   : > { %329 = vmatpush1.msra.mxu0 %v296_v1  ;;  %399 = vmatprep.subr.mxu1 %v299_v3  ;;  %v287_v7 = vld [vmem:[%s1702_s1 + $0x210] sm:$0xff]  ;;  %v294_v8 = vld [vmem:[%s1702_s1 + $0x248] sm:$0xff]  ;;  %v293_v10 = vld [vmem:[%s1702_s1 + $0x240] sm:$0xff]  ;;  %s215_s27 = scalar_lea.vmem %s1701_s0, %s902_s10  ;;  %s219_s14 = scalar_lea.vmem %s1706_s5, %s902_s10 }
   0xe   : > { %330 = vmatprep.subr.mxu0 %v292_v2  ;;  %400 = vmatpush1.msra.mxu1 %v298_v5  ;;  %v286_v9 = vld [vmem:[%s1702_s1 + $0x208] sm:$0xff]  ;;  %v289_v11 = vld [vmem:[%s1702_s1 + $0x220] sm:$0xff]  ;;  %v288_v13 = vld [vmem:[%s1702_s1 + $0x218] sm:$0xff] }
   0xf   : > { %331 = vmatpush1.msra.mxu0 %v291_v4  ;;  %401 = vmatprep.subr.mxu1 %v294_v8  ;;  %v282_v12 = vld [vmem:[%s1702_s1 + $0x1e8] sm:$0xff]  ;;  %v281_v14 = vld [vmem:[%s1702_s1 + $0x1e0] sm:$0xff]  ;;  %v284_v15 = vld [vmem:[%s1702_s1 + $0x1f8] sm:$0xff] }
  0x10   : > { %332 = vmatprep.subr.mxu0 %v287_v7  ;;  %402 = vmatpush1.msra.mxu1 %v293_v10  ;;  %v277_v16 = vld [vmem:[%s1702_s1 + $0x1c0] sm:$0xff]  ;;  %v283_v17 = vld [vmem:[%s1702_s1 + $0x1f0] sm:$0xff]  ;;  %v276_v18 = vld [vmem:[%s1702_s1 + $0x1b8] sm:$0xff] }
  0x11   : > { %333 = vmatpush1.msra.mxu0 %v286_v9  ;;  %403 = vmatprep.subr.mxu1 %v289_v11  ;;  %v279_v19 = vld [vmem:[%s1702_s1 + $0x1d0] sm:$0xff]  ;;  %v272_v20 = vld [vmem:[%s1702_s1 + $0x198] sm:$0xff]  ;;  %v278_v21 = vld [vmem:[%s1702_s1 + $0x1c8] sm:$0xff] }
  0x12   : > { %334 = vmatprep.subr.mxu0 %v282_v12  ;;  %404 = vmatpush1.msra.mxu1 %v288_v13  ;;  %v271_v22 = vld [vmem:[%s1702_s1 + $0x190] sm:$0xff]  ;;  %v274_v23 = vld [vmem:[%s1702_s1 + $0x1a8] sm:$0xff]  ;;  %v273_v25 = vld [vmem:[%s1702_s1 + $0x1a0] sm:$0xff] }
  0x13   : > { %335 = vmatpush1.msra.mxu0 %v281_v14  ;;  %405 = vmatprep.subr.mxu1 %v284_v15  ;;  %v267_v24 = vld [vmem:[%s1702_s1 + $0x170] sm:$0xff]  ;;  %v266_v26 = vld [vmem:[%s1702_s1 + $0x168] sm:$0xff]  ;;  %v269_v27 = vld [vmem:[%s1702_s1 + $0x180] sm:$0xff] }
  0x14   : > { %336 = vmatprep.subr.mxu0 %v277_v16  ;;  %406 = vmatpush1.msra.mxu1 %v283_v17  ;;  %v262_v28 = vld [vmem:[%s1702_s1 + $0x148] sm:$0xff]  ;;  %v268_v29 = vld [vmem:[%s1702_s1 + $0x178] sm:$0xff]  ;;  %v261_v30 = vld [vmem:[%s1702_s1 + $0x140] sm:$0xff] }
  0x15   : > { %337 = vmatpush1.msra.mxu0 %v276_v18  ;;  %407 = vmatprep.subr.mxu1 %v279_v19  ;;  %v264_v31 = vld [vmem:[%s1702_s1 + $0x158] sm:$0xff]  ;;  %v257_v32 = vld [vmem:[%s1702_s1 + $0x120] sm:$0xff]  ;;  %v263_v33 = vld [vmem:[%s1702_s1 + $0x150] sm:$0xff] }
  0x16   : > { %338 = vmatprep.subr.mxu0 %v272_v20  ;;  %408 = vmatpush1.msra.mxu1 %v278_v21  ;;  %v256_v34 = vld [vmem:[%s1702_s1 + $0x118] sm:$0xff]  ;;  %v259_v35 = vld [vmem:[%s1702_s1 + $0x130] sm:$0xff]  ;;  %v258_v37 = vld [vmem:[%s1702_s1 + $0x128] sm:$0xff] }
  0x17   : > { %339 = vmatpush1.msra.mxu0 %v271_v22  ;;  %409 = vmatprep.subr.mxu1 %v274_v23  ;;  %v252_v36 = vld [vmem:[%s1702_s1 + $0xf8] sm:$0xff]  ;;  %v251_v38 = vld [vmem:[%s1702_s1 + $0xf0] sm:$0xff]  ;;  %v254_v39 = vld [vmem:[%s1702_s1 + $0x108] sm:$0xff] }
  0x18   : > { %340 = vmatprep.subr.mxu0 %v267_v24  ;;  %410 = vmatpush1.msra.mxu1 %v273_v25  ;;  %v247_v40 = vld [vmem:[%s1702_s1 + $0xd0] sm:$0xff]  ;;  %v253_v41 = vld [vmem:[%s1702_s1 + $0x100] sm:$0xff]  ;;  %v246_v42 = vld [vmem:[%s1702_s1 + $0xc8] sm:$0xff] }
  0x19   : > { %341 = vmatpush1.msra.mxu0 %v266_v26  ;;  %411 = vmatprep.subr.mxu1 %v269_v27  ;;  %v249_v43 = vld [vmem:[%s1702_s1 + $0xe0] sm:$0xff]  ;;  %v242_v44 = vld [vmem:[%s1702_s1 + $0xa8] sm:$0xff]  ;;  %v248_v45 = vld [vmem:[%s1702_s1 + $0xd8] sm:$0xff] }
  0x1a   : > { %342 = vmatprep.subr.mxu0 %v262_v28  ;;  %412 = vmatpush1.msra.mxu1 %v268_v29  ;;  %v241_v46 = vld [vmem:[%s1702_s1 + $0xa0] sm:$0xff]  ;;  %v244_v47 = vld [vmem:[%s1702_s1 + $0xb8] sm:$0xff]  ;;  %v243_v49 = vld [vmem:[%s1702_s1 + $0xb0] sm:$0xff] }
  0x1b   : > { %343 = vmatpush1.msra.mxu0 %v261_v30  ;;  %413 = vmatprep.subr.mxu1 %v264_v31  ;;  %v237_v48 = vld [vmem:[%s1702_s1 + $0x80] sm:$0xff]  ;;  %v236_v50 = vld [vmem:[%s1702_s1 + $0x78] sm:$0xff]  ;;  %v239_v51 = vld [vmem:[%s1702_s1 + $0x90] sm:$0xff] }
  0x1c   : > { %344 = vmatprep.subr.mxu0 %v257_v32  ;;  %414 = vmatpush1.msra.mxu1 %v263_v33  ;;  %v232_v52 = vld [vmem:[%s1702_s1 + $0x58] sm:$0xff]  ;;  %v238_v53 = vld [vmem:[%s1702_s1 + $0x88] sm:$0xff]  ;;  %v231_v54 = vld [vmem:[%s1702_s1 + $0x50] sm:$0xff] }
  0x1d   : > { %345 = vmatpush1.msra.mxu0 %v256_v34  ;;  %415 = vmatprep.subr.mxu1 %v259_v35  ;;  %v234_v55 = vld [vmem:[%s1702_s1 + $0x68] sm:$0xff]  ;;  %v227_v56 = vld [vmem:[%s1702_s1 + $0x30] sm:$0xff]  ;;  %v233_v57 = vld [vmem:[%s1702_s1 + $0x60] sm:$0xff] }
  0x1e   : > { %346 = vmatprep.subr.mxu0 %v252_v36  ;;  %416 = vmatpush1.msra.mxu1 %v258_v37  ;;  %v226_v58 = vld [vmem:[%s1702_s1 + $0x28] sm:$0xff]  ;;  %v229_v59 = vld [vmem:[%s1702_s1 + $0x40] sm:$0xff]  ;;  %v228_v61 = vld [vmem:[%s1702_s1 + $0x38] sm:$0xff] }
  0x1f   : > { %347 = vmatpush1.msra.mxu0 %v251_v38  ;;  %417 = vmatprep.subr.mxu1 %v254_v39  ;;  %v222_v60 = vld [vmem:[%s1702_s1 + $0x8] sm:$0xff]  ;;  %v221_v62 = vld [vmem:[%s1702_s1] sm:$0xff]  ;;  %v224_v63 = vld [vmem:[%s1702_s1 + $0x18] sm:$0xff] }
  0x20   : > { %348 = vmatprep.subr.mxu0 %v247_v40  ;;  %418 = vmatpush1.msra.mxu1 %v253_v41  ;;  %v1347_v0 = vld [vmem:[%s215_s27] sm:$0xff]  ;;  %v223_v1 = vld [vmem:[%s1702_s1 + $0x10] sm:$0xff]  ;;  %v300_v2 = vld [vmem:[%s1702_s1 + $0x278] sm:$0xff] }
  0x21   : > { %349 = vmatpush1.msra.mxu0 %v246_v42  ;;  %419 = vmatprep.subr.mxu1 %v249_v43  ;;  %v295_v3 = vld [vmem:[%s1702_s1 + $0x250] sm:$0xff]  ;;  %v576_v4 = vld [vmem:[%s1704_s3 + $0xf8] sm:$0xff]  ;;  %v290_v7 = vld [vmem:[%s1702_s1 + $0x228] sm:$0xff] }
  0x22   : > { %350 = vmatprep.subr.mxu0 %v242_v44  ;;  %420 = vmatpush1.msra.mxu1 %v248_v45  ;;  %v560_v5 = vld [vmem:[%s1704_s3 + $0x78] sm:$0xff]  ;;  %v575_v8 = vld [vmem:[%s1704_s3 + $0xf0] sm:$0xff]  ;;  %v285_v10 = vld [vmem:[%s1702_s1 + $0x200] sm:$0xff] }
  0x23   : > { %351 = vmatpush1.msra.mxu0 %v241_v46  ;;  %421 = vmatprep.subr.mxu1 %v244_v47  ;;  %v559_v9 = vld [vmem:[%s1704_s3 + $0x70] sm:$0xff]  ;;  %v574_v11 = vld [vmem:[%s1704_s3 + $0xe8] sm:$0xff]  ;;  %v280_v13 = vld [vmem:[%s1702_s1 + $0x1d8] sm:$0xff] }
  0x24   : > { %352 = vmatprep.subr.mxu0 %v237_v48  ;;  %422 = vmatpush1.msra.mxu1 %v243_v49  ;;  %v558_v12 = vld [vmem:[%s1704_s3 + $0x68] sm:$0xff]  ;;  %v573_v14 = vld [vmem:[%s1704_s3 + $0xe0] sm:$0xff]  ;;  %v275_v16 = vld [vmem:[%s1702_s1 + $0x1b0] sm:$0xff] }
  0x25   : > { %353 = vmatpush1.msra.mxu0 %v236_v50  ;;  %423 = vmatprep.subr.mxu1 %v239_v51  ;;  %v557_v15 = vld [vmem:[%s1704_s3 + $0x60] sm:$0xff]  ;;  %v572_v17 = vld [vmem:[%s1704_s3 + $0xd8] sm:$0xff]  ;;  %v270_v19 = vld [vmem:[%s1702_s1 + $0x188] sm:$0xff] }
  0x26   : > { %354 = vmatprep.subr.mxu0 %v232_v52  ;;  %424 = vmatpush1.msra.mxu1 %v238_v53  ;;  %v556_v18 = vld [vmem:[%s1704_s3 + $0x58] sm:$0xff]  ;;  %v571_v20 = vld [vmem:[%s1704_s3 + $0xd0] sm:$0xff]  ;;  %v265_v22 = vld [vmem:[%s1702_s1 + $0x160] sm:$0xff] }
  0x27   : > { %355 = vmatpush1.msra.mxu0 %v231_v54  ;;  %425 = vmatprep.subr.mxu1 %v234_v55  ;;  %v555_v21 = vld [vmem:[%s1704_s3 + $0x50] sm:$0xff]  ;;  %v570_v23 = vld [vmem:[%s1704_s3 + $0xc8] sm:$0xff]  ;;  %v260_v25 = vld [vmem:[%s1702_s1 + $0x138] sm:$0xff] }
  0x28   : > { %356 = vmatprep.subr.mxu0 %v227_v56  ;;  %426 = vmatpush1.msra.mxu1 %v233_v57  ;;  %v554_v24 = vld [vmem:[%s1704_s3 + $0x48] sm:$0xff]  ;;  %v569_v26 = vld [vmem:[%s1704_s3 + $0xc0] sm:$0xff]  ;;  %v255_v28 = vld [vmem:[%s1702_s1 + $0x110] sm:$0xff] }
  0x29   : > { %357 = vmatpush1.msra.mxu0 %v226_v58  ;;  %427 = vmatprep.subr.mxu1 %v229_v59  ;;  %v553_v27 = vld [vmem:[%s1704_s3 + $0x40] sm:$0xff]  ;;  %v568_v29 = vld [vmem:[%s1704_s3 + $0xb8] sm:$0xff]  ;;  %v250_v31 = vld [vmem:[%s1702_s1 + $0xe8] sm:$0xff] }
  0x2a   : > { %358 = vmatprep.subr.mxu0 %v222_v60  ;;  %428 = vmatpush1.msra.mxu1 %v228_v61  ;;  %v552_v30 = vld [vmem:[%s1704_s3 + $0x38] sm:$0xff]  ;;  %v567_v32 = vld [vmem:[%s1704_s3 + $0xb0] sm:$0xff]  ;;  %v245_v34 = vld [vmem:[%s1702_s1 + $0xc0] sm:$0xff] }
  0x2b   : > { %359 = vmatpush1.msra.mxu0 %v221_v62  ;;  %429 = vmatprep.subr.mxu1 %v224_v63  ;;  %v551_v33 = vld [vmem:[%s1704_s3 + $0x30] sm:$0xff]  ;;  %v566_v35 = vld [vmem:[%s1704_s3 + $0xa8] sm:$0xff]  ;;  %v240_v37 = vld [vmem:[%s1702_s1 + $0x98] sm:$0xff] }
  0x2c   : > { %393 = vmatmul.mubr.f32.vlgmr.msra.gmra.mxu0 %v1347_v0  ;;  %1011 = vmatprep.subr.mxu0 %v1099_v6  ;;  %v550_v36 = vld [vmem:[%s1704_s3 + $0x28] sm:$0xff]  ;;  %v565_v38 = vld [vmem:[%s1704_s3 + $0xa0] sm:$0xff]  ;;  %v235_v40 = vld [vmem:[%s1702_s1 + $0x70] sm:$0xff] }
  0x2d   : > { %430 = vmatpush1.msra.mxu1 %v223_v1  ;;  %463 = vmatprep.mubr.f32.mxu1 %v1099_v6  ;;  %v549_v39 = vld [vmem:[%s1704_s3 + $0x20] sm:$0xff]  ;;  %v564_v41 = vld [vmem:[%s1704_s3 + $0x98] sm:$0xff]  ;;  %v230_v42 = vld [vmem:[%s1702_s1 + $0x48] sm:$0xff] }
  0x2e   : > { %1012 = vmatpush3.msra.mxu0 %v300_v2  ;;  %464 = vmatmul.mubr.f32.vlgmr.msra.gmra.mxu1 %v1347_v0  ;;  %v225_v43 = vld [vmem:[%s1702_s1 + $0x20] sm:$0xff]  ;;  %v608_v44 = vld [vmem:[%s1704_s3 + $0x1f8] sm:$0xff]  ;;  %v607_v46 = vld [vmem:[%s1704_s3 + $0x1f0] sm:$0xff] }
  0x2f   : > { %1013 = vmatprep.subr.mxu0 %v1099_v6  ;;  %1043 = vmatprep.mubr.msk.f32.mxu0 %vm1100_vm0, %v1099_v6  ;;  %v592_v45 = vld [vmem:[%s1704_s3 + $0x178] sm:$0xff]  ;;  %v591_v47 = vld [vmem:[%s1704_s3 + $0x170] sm:$0xff]  ;;  %v606_v48 = vld [vmem:[%s1704_s3 + $0x1e8] sm:$0xff] }
  0x30   : > { %1014 = vmatpush3.msra.mxu0 %v295_v3  ;;  %924 = vmatprep.subr.mxu1 %v576_v4  ;;  %v590_v49 = vld [vmem:[%s1704_s3 + $0x168] sm:$0xff]  ;;  %v605_v50 = vld [vmem:[%s1704_s3 + $0x1e0] sm:$0xff]  ;;  %v604_v52 = vld [vmem:[%s1704_s3 + $0x1d8] sm:$0xff] }
  0x31   : > { %1015 = vmatprep.subr.mxu0 %v1099_v6  ;;  %925 = vmatpush3.msra.mxu1 %v560_v5  ;;  %v589_v51 = vld [vmem:[%s1704_s3 + $0x160] sm:$0xff]  ;;  %v588_v53 = vld [vmem:[%s1704_s3 + $0x158] sm:$0xff]  ;;  %v603_v54 = vld [vmem:[%s1704_s3 + $0x1d0] sm:$0xff] }
  0x32   : > { %1016 = vmatpush3.msra.mxu0 %v290_v7  ;;  %926 = vmatprep.subr.mxu1 %v575_v8  ;;  %v587_v55 = vld [vmem:[%s1704_s3 + $0x150] sm:$0xff]  ;;  %v602_v56 = vld [vmem:[%s1704_s3 + $0x1c8] sm:$0xff]  ;;  %v601_v58 = vld [vmem:[%s1704_s3 + $0x1c0] sm:$0xff] }
  0x33   : > { %1017 = vmatprep.subr.mxu0 %v1099_v6  ;;  %927 = vmatpush3.msra.mxu1 %v559_v9  ;;  %v586_v57 = vld [vmem:[%s1704_s3 + $0x148] sm:$0xff]  ;;  %v585_v59 = vld [vmem:[%s1704_s3 + $0x140] sm:$0xff]  ;;  %v600_v60 = vld [vmem:[%s1704_s3 + $0x1b8] sm:$0xff] }
  0x34   : > { %1018 = vmatpush3.msra.mxu0 %v285_v10  ;;  %928 = vmatprep.subr.mxu1 %v574_v11  ;;  %v584_v61 = vld [vmem:[%s1704_s3 + $0x138] sm:$0xff]  ;;  %v599_v62 = vld [vmem:[%s1704_s3 + $0x1b0] sm:$0xff]  ;;  %v582_v1 = vld [vmem:[%s1704_s3 + $0x128] sm:$0xff] }
  0x35   : > { %1019 = vmatprep.subr.mxu0 %v1099_v6  ;;  %929 = vmatpush3.msra.mxu1 %v558_v12  ;;  %v583_v63 = vld [vmem:[%s1704_s3 + $0x130] sm:$0xff]  ;;  %v548_v2 = vld [vmem:[%s1704_s3 + $0x18] sm:$0xff]  ;;  %v597_v3 = vld [vmem:[%s1704_s3 + $0x1a0] sm:$0xff] }
  0x36   : > { %1020 = vmatpush3.msra.mxu0 %v280_v13  ;;  %930 = vmatprep.subr.mxu1 %v573_v14  ;;  %v563_v4 = vld [vmem:[%s1704_s3 + $0x90] sm:$0xff]  ;;  %v581_v5 = vld [vmem:[%s1704_s3 + $0x120] sm:$0xff]  ;;  %v596_v8 = vld [vmem:[%s1704_s3 + $0x198] sm:$0xff] }
  0x37   : > { %1021 = vmatprep.subr.mxu0 %v1099_v6  ;;  %931 = vmatpush3.msra.mxu1 %v557_v15  ;;  %v547_v7 = vld [vmem:[%s1704_s3 + $0x10] sm:$0xff]  ;;  %v562_v9 = vld [vmem:[%s1704_s3 + $0x88] sm:$0xff]  ;;  %v580_v10 = vld [vmem:[%s1704_s3 + $0x118] sm:$0xff] }
  0x38   : > { %1022 = vmatpush3.msra.mxu0 %v275_v16  ;;  %932 = vmatprep.subr.mxu1 %v572_v17  ;;  %v546_v11 = vld [vmem:[%s1704_s3 + $0x8] sm:$0xff]  ;;  %v595_v12 = vld [vmem:[%s1704_s3 + $0x190] sm:$0xff]  ;;  %v561_v13 = vld [vmem:[%s1704_s3 + $0x80] sm:$0xff] }
  0x39   : > { %1023 = vmatprep.subr.mxu0 %v1099_v6  ;;  %933 = vmatpush3.msra.mxu1 %v556_v18  ;;  %v579_v14 = vld [vmem:[%s1704_s3 + $0x110] sm:$0xff]  ;;  %v545_v15 = vld [vmem:[%s1704_s3] sm:$0xff]  ;;  %v594_v16 = vld [vmem:[%s1704_s3 + $0x188] sm:$0xff] }
  0x3a   : > { %1024 = vmatpush3.msra.mxu0 %v270_v19  ;;  %934 = vmatprep.subr.mxu1 %v571_v20  ;;  %v578_v17 = vld [vmem:[%s1704_s3 + $0x108] sm:$0xff]  ;;  %v593_v18 = vld [vmem:[%s1704_s3 + $0x180] sm:$0xff]  ;;  %v303_v20 = vlaneseq }
  0x3b   : > { %1025 = vmatprep.subr.mxu0 %v1099_v6  ;;  %935 = vmatpush3.msra.mxu1 %v555_v21  ;;  %v577_v19 = vld [vmem:[%s1704_s3 + $0x100] sm:$0xff] }
  0x3c   : > { %1026 = vmatpush3.msra.mxu0 %v265_v22  ;;  %936 = vmatprep.subr.mxu1 %v570_v23  ;;  %v1615_v21 = vshrl.u32 %v303_v20, 7  ;;  %v301_v23 = vld [vmem:[%s1703_s2] sm:$0x1f] }
  0x3d   : > { %1027 = vmatprep.subr.mxu0 %v1099_v6  ;;  %937 = vmatpush3.msra.mxu1 %v554_v24 }
  0x3e   : > { %1028 = vmatpush3.msra.mxu0 %v260_v25  ;;  %938 = vmatprep.subr.mxu1 %v569_v26  ;;  %v305_v22 = vsub.s32 0, %v1615_v21  ;;  %v309_v24 = vsub.s32 1, %v1615_v21  ;;  %v313_v25 = vsub.s32 2, %v1615_v21  ;;  %v317_v26 = vsub.s32 3, %v1615_v21 }
  0x3f   : > { %1029 = vmatprep.subr.mxu0 %v1099_v6  ;;  %939 = vmatpush3.msra.mxu1 %v553_v27 }
  0x40   : > { %1030 = vmatpush3.msra.mxu0 %v255_v28  ;;  %940 = vmatprep.subr.mxu1 %v568_v29  ;;  %v306_v27 = vrot.slane %v301_v23, %v305_v22  ;;  %v310_v28 = vrot.slane %v301_v23, %v309_v24  ;;  %v314_v29 = vrot.slane %v301_v23, %v313_v25 }
  0x41   : > { %1031 = vmatprep.subr.mxu0 %v1099_v6  ;;  %941 = vmatpush3.msra.mxu1 %v552_v30 }
  0x42   : > { %1032 = vmatpush3.msra.mxu0 %v250_v31  ;;  %942 = vmatprep.subr.mxu1 %v567_v32  ;;  %v318_v31 = vrot.slane %v301_v23, %v317_v26 }
  0x43   : > { %1033 = vmatprep.subr.mxu0 %v1099_v6  ;;  %943 = vmatpush3.msra.mxu1 %v551_v33 }
  0x44   : > { %1034 = vmatpush3.msra.mxu0 %v245_v34  ;;  %944 = vmatprep.subr.mxu1 %v566_v35 }
  0x45   : > { %1035 = vmatprep.subr.mxu0 %v1099_v6  ;;  %945 = vmatpush3.msra.mxu1 %v550_v36 }
  0x46   : > { %1036 = vmatpush3.msra.mxu0 %v240_v37  ;;  %946 = vmatprep.subr.mxu1 %v565_v38 }
  0x47   : > { %1037 = vmatprep.subr.mxu0 %v1099_v6  ;;  %947 = vmatpush3.msra.mxu1 %v549_v39 }
  0x48   : > { %1038 = vmatpush3.msra.mxu0 %v235_v40  ;;  %948 = vmatprep.subr.mxu1 %v564_v41 }
  0x49   : > { %1039 = vmatprep.subr.mxu0 %v1099_v6  ;;  %949 = vmatpush3.msra.mxu1 %v548_v2 }
  0x4a   : > { %1040 = vmatpush3.msra.mxu0 %v230_v42  ;;  %950 = vmatprep.subr.mxu1 %v563_v4  ;;  %v624_v42 = vld [vmem:[%s1704_s3 + $0x278] sm:$0xff] }
  0x4b   : > { %1041 = vmatprep.subr.mxu0 %v1099_v6  ;;  %951 = vmatpush3.msra.mxu1 %v547_v7 }
  0x4c   : > { %1042 = vmatpush3.msra.mxu0 %v225_v43  ;;  %952 = vmatprep.subr.mxu1 %v562_v9 }
  0x4d   : > { %1044 = vmatmul.mubr.f32.vlgmr.msra.gmra.mxu0 %v1347_v0  ;;  %959 = vmatprep.subr.mxu0 %v608_v44  ;;  %v598_v0 = vld [vmem:[%s1704_s3 + $0x1a8] sm:$0xff]  ;;  %v623_v44 = vld [vmem:[%s1704_s3 + $0x270] sm:$0xff] }
  0x4e   : > { %960 = vmatpush3.msra.mxu0 %v592_v45  ;;  %953 = vmatpush3.msra.mxu1 %v546_v11  ;;  %v622_v45 = vld [vmem:[%s1704_s3 + $0x268] sm:$0xff] }
  0x4f   : > { %961 = vmatprep.subr.mxu0 %v607_v46  ;;  %954 = vmatprep.subr.mxu1 %v561_v13  ;;  %v621_v46 = vld [vmem:[%s1704_s3 + $0x260] sm:$0xff] }
  0x50   : > { %962 = vmatpush3.msra.mxu0 %v591_v47  ;;  %955 = vmatpush3.msra.mxu1 %v545_v15  ;;  %v620_v47 = vld [vmem:[%s1704_s3 + $0x258] sm:$0xff] }
  0x51   : > { %963 = vmatprep.subr.mxu0 %v606_v48  ;;  %1046 = vmatprep.subr.mxu1 %v1099_v6  ;;  %v619_v48 = vld [vmem:[%s1704_s3 + $0x250] sm:$0xff] }
  0x52   : > { %964 = vmatpush3.msra.mxu0 %v590_v49  ;;  %v618_v49 = vld [vmem:[%s1704_s3 + $0x248] sm:$0xff] }
  0x53   : > { %965 = vmatprep.subr.mxu0 %v605_v50  ;;  %v617_v50 = vld [vmem:[%s1704_s3 + $0x240] sm:$0xff] }
  0x54   : > { %966 = vmatpush3.msra.mxu0 %v589_v51  ;;  %v616_v51 = vld [vmem:[%s1704_s3 + $0x238] sm:$0xff] }
  0x55   : > { %967 = vmatprep.subr.mxu0 %v604_v52  ;;  %v615_v52 = vld [vmem:[%s1704_s3 + $0x230] sm:$0xff] }
  0x56   : > { %968 = vmatpush3.msra.mxu0 %v588_v53  ;;  %v614_v53 = vld [vmem:[%s1704_s3 + $0x228] sm:$0xff] }
  0x57   : > { %969 = vmatprep.subr.mxu0 %v603_v54  ;;  %v321_v54 = vsub.s32 4, %v1615_v21 }
  0x58   : > { %970 = vmatpush3.msra.mxu0 %v587_v55  ;;  %v613_v55 = vld [vmem:[%s1704_s3 + $0x220] sm:$0xff] }
  0x59   : > { %971 = vmatprep.subr.mxu0 %v602_v56  ;;  %v322_v56 = vrot.slane %v301_v23, %v321_v54 }
  0x5a   : > { %972 = vmatpush3.msra.mxu0 %v586_v57  ;;  %v612_v57 = vld [vmem:[%s1704_s3 + $0x218] sm:$0xff] }
  0x5b   : > { %973 = vmatprep.subr.mxu0 %v601_v58  ;;  %v611_v58 = vld [vmem:[%s1704_s3 + $0x210] sm:$0xff] }
  0x5c   : > { %974 = vmatpush3.msra.mxu0 %v585_v59 }
  0x5d   : > { %975 = vmatprep.subr.mxu0 %v600_v60 }
  0x5e   : > { %976 = vmatpush3.msra.mxu0 %v584_v61  ;;  %v610_v61 = vld [vmem:[%s1704_s3 + $0x208] sm:$0xff] }
  0x5f   : > { %977 = vmatprep.subr.mxu0 %v599_v62 }
  0x60   : > { %978 = vmatpush3.msra.mxu0 %v583_v63 }
  0x61   : > { %979 = vmatprep.subr.mxu0 %v598_v0  ;;  %v609_v0 = vld [vmem:[%s1704_s3 + $0x200] sm:$0xff] }
  0x62   : > { %980 = vmatpush3.msra.mxu0 %v582_v1 }
  0x63   : > { %981 = vmatprep.subr.mxu0 %v597_v3 }
  0x64   : > { %982 = vmatpush3.msra.mxu0 %v581_v5  ;;  %v904_v5 = vld [vmem:[%s1705_s4] ss:$0 sm:$0xff] }
  0x65   : > { %983 = vmatprep.subr.mxu0 %v596_v8 }
  0x66   : > { %984 = vmatpush3.msra.mxu0 %v580_v10 }
  0x67   : > { %985 = vmatprep.subr.mxu0 %v595_v12 }
  0x68   : > { %986 = vmatpush3.msra.mxu0 %v579_v14 }
  0x69   : > { %987 = vmatprep.subr.mxu0 %v594_v16 }
  0x6a   : > { %988 = vmatpush3.msra.mxu0 %v578_v17 }
  0x6b   : > { %989 = vmatprep.subr.mxu0 %v593_v18 }
  0x6c   : > { %990 = vmatpush3.msra.mxu0 %v577_v19 }
  0xec   : > { %v394_v30 = vpop.f32.mrf.mxu0 }
  0xed   : > { %v395_v32 = vadd.f32 %v394_v30, %v306_v27 }
  0xee   : > { %v396_v33 = vpop.f32.mrf.mxu0  ;;  %v465_v34 = vpop.f32.mrf.mxu1 }
  0xef   : > { %v397_v35 = vadd.f32 %v396_v33, %v310_v28  ;;  %v466_v36 = vadd.f32 %v465_v34, %v314_v29  ;;  %v540_v40 = vmax.f32 %v395_v32, 0.0 }
  0xf0   : > { %v467_v37 = vpop.f32.mrf.mxu1 }
  0xf1   : > { %v541_v38 = vmax.f32 %v397_v35, 0.0  ;;  %v468_v39 = vadd.f32 %v467_v37, %v318_v31  ;;  %v542_v41 = vmax.f32 %v466_v36, 0.0 }
  0xf3   : > { %v543_v43 = vmax.f32 %v468_v39, 0.0  ;;  %696 = vmatprep.mubr.f32.mxu1 %v541_v38 }
  0xf4   : > { %697 = vmatmul.mubr.f32.vlgmr.msra.gmra.mxu1 %v540_v40 }
  0xf5   : > { %1047 = vmatpush3.msra.mxu1 %v624_v42  ;;  %766 = vmatprep.mubr.f32.mxu0 %v543_v43 }
  0xf6   : > { %1048 = vmatprep.subr.mxu1 %v1099_v6  ;;  %767 = vmatmul.mubr.f32.vlgmr.msra.gmra.mxu0 %v542_v41 }
  0xf7   : > { %1049 = vmatpush3.msra.mxu1 %v623_v44  ;;  %1078 = vmatprep.mubr.msk.f32.mxu1 %vm1100_vm0, %v1099_v6 }
  0xf8   : > { %1050 = vmatprep.subr.mxu1 %v1099_v6 }
  0xf9   : > { %1051 = vmatpush3.msra.mxu1 %v622_v45 }
  0xfa   : > { %1052 = vmatprep.subr.mxu1 %v1099_v6 }
  0xfb   : > { %1053 = vmatpush3.msra.mxu1 %v621_v46 }
  0xfc   : > { %1054 = vmatprep.subr.mxu1 %v1099_v6 }
  0xfd   : > { %1055 = vmatpush3.msra.mxu1 %v620_v47 }
  0xfe   : > { %1056 = vmatprep.subr.mxu1 %v1099_v6 }
  0xff   : > { %1057 = vmatpush3.msra.mxu1 %v619_v48 }
 0x100   : > { %1058 = vmatprep.subr.mxu1 %v1099_v6 }
 0x101   : > { %1059 = vmatpush3.msra.mxu1 %v618_v49 }
 0x102   : > { %1060 = vmatprep.subr.mxu1 %v1099_v6 }
 0x103   : > { %1061 = vmatpush3.msra.mxu1 %v617_v50 }
 0x104   : > { %1062 = vmatprep.subr.mxu1 %v1099_v6 }
 0x105   : > { %1063 = vmatpush3.msra.mxu1 %v616_v51 }
 0x106   : > { %1064 = vmatprep.subr.mxu1 %v1099_v6 }
 0x107   : > { %1065 = vmatpush3.msra.mxu1 %v615_v52 }
 0x108   : > { %1066 = vmatprep.subr.mxu1 %v1099_v6 }
 0x109   : > { %1067 = vmatpush3.msra.mxu1 %v614_v53 }
 0x10a   : > { %1068 = vmatprep.subr.mxu1 %v1099_v6 }
 0x10b   : > { %1069 = vmatpush3.msra.mxu1 %v613_v55 }
 0x10c   : > { %1070 = vmatprep.subr.mxu1 %v1099_v6 }
 0x10d   : > { %v536_v59 = vpop.f32.mrf.mxu0  ;;  %1071 = vmatpush3.msra.mxu1 %v612_v57 }
 0x10e   : > { %v537_v60 = vadd.f32 %v536_v59, %v322_v56  ;;  %1072 = vmatprep.subr.mxu1 %v1099_v6 }
 0x10f   : > { %v1045_v62 = vpop.f32.mrf.mxu0  ;;  %1073 = vmatpush3.msra.mxu1 %v611_v58 }
 0x110   : > { %v544_v63 = vmax.f32 %v537_v60, 0.0  ;;  %1074 = vmatprep.subr.mxu1 %v1099_v6 }
 0x111   : > { %1075 = vmatpush3.msra.mxu1 %v610_v61 }
 0x112   : > { %1076 = vmatprep.subr.mxu1 %v1099_v6 }
 0x113   : > { %1077 = vmatpush3.msra.mxu1 %v609_v0 }
 0x114   : > { %1079 = vmatmul.mubr.f32.vlgmr.msra.gmra.mxu1 %v544_v63 }
 0x1b4   : > { %v956_v1 = vpop.f32.mrf.mxu1 }
 0x1b6   : > { %v957_v2 = vpop.f32.mrf.mxu1  ;;  %v991_v3 = vpop.f32.mrf.mxu0 }
 0x1b7   : > { %v958_v4 = vadd.f32 %v957_v2, %v956_v1 }
 0x1b8   : > { %v992_v7 = vpop.f32.mrf.mxu0 }
 0x1b9   : > { %v699_v8 = vadd.f32 %v958_v4, %v904_v5  ;;  %v993_v9 = vadd.f32 %v992_v7, %v991_v3 }
 0x1bb   : > { %v769_v10 = vadd.f32 %v993_v9, %v699_v8 }
 0x1d4   : > { %v838_v6 = vpop.f32.mrf.mxu1 }
 0x1d5   : > { %v839_v11 = vadd.f32 %v838_v6, %v769_v10 }
 0x1d6   : > { %v1080_v12 = vpop.f32.mrf.mxu1 }
 0x1d7   : > { %843 = vst.msk [vmem:[%s219_s14] sm:$0xff] %vm842_vm1, %v839_v11 }
 0x1d8 PF: > { %s15_s18 = sadd.s32 1, %s1097_s18  }
 0x1d9   : > { %p12_p4 = scmp.ge.s32.totalorder %s15_s18, 5  }
 0x1db   :  { %14 = sbr.rel (!%p12_p4) target bundleno = 1 (0x1), region = 70 }

</bundles_post_ra>
